<compile_context>
chip_gen: v5e
topology: v5e:2x2
jax: 0.10.0
libtpu: 0.0.40
codegen_flags: <defaults>
</compile_context>

<pallas_src>
import functools

import jax
import jax.numpy as jnp
from jax import lax
from jax.experimental import pallas as pl
from jax.experimental.pallas import tpu as pltpu

# ---------------------------------------------------------------------------
# "haar" constants (deterministic, defined in-script; no checkpoint load).
# ---------------------------------------------------------------------------
HORIZONTAL = 0
VERTICAL = 1
UP_DIAGONAL = 2
DOWN_DIAGONAL = 3
LOW_PASS = 0
DETAIL = 1

DECONV_KERNELS = {
    HORIZONTAL: {
        LOW_PASS: [[0.5, 0.5]],
        DETAIL: [[0.5, -0.5]],
    },
    VERTICAL: {
        LOW_PASS: [[0.5], [0.5]],
        DETAIL: [[0.5], [-0.5]],
    },
    UP_DIAGONAL: {
        LOW_PASS: [[0.5, 0.5], [0.5, 0.5]],
        DETAIL: [[0.5, -0.5], [-0.5, 0.5]],
    },
    DOWN_DIAGONAL: {
        LOW_PASS: [[0.5, 0.5], [0.5, 0.5]],
        DETAIL: [[-0.5, 0.5], [0.5, -0.5]],
    },
}

_STRIDES = {
    HORIZONTAL: (1, 2),
    VERTICAL: (2, 1),
    UP_DIAGONAL: (2, 2),
    DOWN_DIAGONAL: (2, 2),
}


def _lp_routing_mask(orientation):
    """lp_mask[a][b] == 1 iff output offset (a, b) takes the low-pass value,
    else it takes the detail value.  Asserts the Haar 0/1-mask property."""
    klow = DECONV_KERNELS[orientation][LOW_PASS]
    kdet = DECONV_KERNELS[orientation][DETAIL]
    sh, sw = _STRIDES[orientation]
    lp_mask = []
    for a in range(sh):
        row = []
        for b in range(sw):
            s = klow[a][b] + kdet[a][b]   # lp coefficient
            d = klow[a][b] - kdet[a][b]   # det coefficient
            assert (s, d) in ((1.0, 0.0), (0.0, 1.0)), "Haar masks must be 0/1"
            row.append(int(round(s)))
        lp_mask.append(row)
    return lp_mask


# ---------------------------------------------------------------------------
# bf16-exact splitting (so the MXU sees true bf16 operands, one pass per dot,
# and the result is still exact after f32 accumulation).
# ---------------------------------------------------------------------------
def _bf16_split(x, n_split):
    """Return bf16 pieces whose exact sum equals x (f32: 3 pieces, bf16: 1)."""
    if x.dtype == jnp.bfloat16:
        return [x]
    xf = x.astype(jnp.float32)
    pieces = []
    rem = xf
    for i in range(n_split):
        p = rem.astype(jnp.bfloat16)
        pieces.append(p)
        if i + 1 < n_split:
            rem = rem - p.astype(jnp.float32)
    return pieces


# ---------------------------------------------------------------------------
# Pallas kernels.
# ---------------------------------------------------------------------------
def _haar_copy_kernel(lp_ref, det_ref, out_ref, *, lp_mask, sh, W):
    """sw == 1 (VERTICAL): each output row-offset slab is a straight copy."""
    for a in range(sh):
        src_ref = lp_ref if lp_mask[a][0] == 1 else det_ref
        out_ref[:, a * W:(a + 1) * W] = src_ref[...]


def _haar_interleave_kernel(p0_ref, p1_ref, lp_ref, det_ref, out_ref, *,
                            lp_mask, sh, W, chunk, n_split):
    """sw == 2: lane interleave via resident 0/1 scatter matrices on the MXU.

    p0_ref / p1_ref : (chunk, 2*chunk) bf16, VMEM-resident (constant index_map).
    lp_ref, det_ref : (TR, W)
    out_ref         : (TR, sh*2*W) -- row-offset slabs concatenated on lanes.
    """
    out_dtype = out_ref.dtype
    row_w = 2 * W

    s = 0
    while s < W:                       # static Python loop (W, chunk are static)
        wc = min(chunk, W - s)
        if wc == chunk:
            pmats = (p0_ref[...], p1_ref[...])
        else:
            # Remainder chunk: the top-left (wc, 2*wc) sub-block of the resident
            # matrices is exactly the scatter matrix for width wc.
            pmats = (p0_ref[:wc, :2 * wc], p1_ref[:wc, :2 * wc])

        # Load + bf16-split the sources ONCE per chunk; reused for every row
        # offset `a` (halves the split work for the diagonal orientations).
        lp_pieces = _bf16_split(lp_ref[:, s:s + wc], n_split)
        det_pieces = _bf16_split(det_ref[:, s:s + wc], n_split)

        for a in range(sh):
            base = a * row_w + 2 * s
            acc = None
            for b in range(2):
                pieces = lp_pieces if lp_mask[a][b] == 1 else det_pieces
                for piece in pieces:
                    term = jnp.dot(piece, pmats[b],
                                   preferred_element_type=jnp.float32)
                    acc = term if acc is None else acc + term
            out_ref[:, base:base + 2 * wc] = acc.astype(out_dtype)
        s += wc


# ---------------------------------------------------------------------------
# Tiling / wrapper.
# ---------------------------------------------------------------------------
def _pick_row_tile(R, W, Wout, itemsize):
    """Row tile: multiple of 16 sublanes, ~10 MiB per (in+out) block so the
    double-buffered footprint stays well inside every chip's VMEM (incl. v7x's
    64 MiB); block count kept even when possible (v7x has 2 TensorCores)."""
    bytes_per_row = (2 * W + Wout) * itemsize
    budget = 10 << 20
    tr = budget // max(bytes_per_row, 1)
    tr = max(16, min(2048, tr))
    tr -= tr % 16
    if tr >= R:
        return R                        # single block (block_shape == full dim)
    count = -(-R // tr)
    if count % 2 == 1:                  # best effort: even block count for 2 TCs
        count += 1
        tr2 = -(-R // count)
        tr2 = ((tr2 + 15) // 16) * 16
        if 16 <= tr2 < R:
            tr = tr2
    return tr


def haar_deconv_pallas(low_pass, detail, orientation, *, row_tile=None):
    """low_pass, detail: (N, C, H, W) arrays. Returns reconstructed NCHW tensor."""
    sh, sw = _STRIDES[orientation]
    lp_mask = _lp_routing_mask(orientation)

    N, C, H, W = low_pass.shape
    R = N * C * H
    Wout = sh * sw * W

    lp2 = low_pass.reshape(R, W)        # free reshape (contiguous)
    det2 = detail.reshape(R, W)

    itemsize = jnp.dtype(low_pass.dtype).itemsize
    if row_tile is None:
        TR = _pick_row_tile(R, W, Wout, itemsize)
    else:
        TR = min(int(row_tile), R)
        if TR < R:
            TR = max(8, TR - TR % 8)

    grid = (pl.cdiv(R, TR),)

    block_bytes = (2 * TR * W + TR * Wout) * itemsize
    vmem_limit = int(min(max(2 * block_bytes + (4 << 20), 16 << 20), 48 << 20))
    cparams = pltpu.CompilerParams(
        dimension_semantics=("parallel",),
        vmem_limit_bytes=vmem_limit,
    )

    if low_pass.dtype == jnp.float32:
        n_split = 3          # 24-bit mantissa -> 3 bf16-exact pieces
    elif low_pass.dtype == jnp.bfloat16:
        n_split = 1          # already MXU-exact
    else:
        n_split = 2          # e.g. float16

    if sw == 1:
        kernel = functools.partial(_haar_copy_kernel,
                                   lp_mask=lp_mask, sh=sh, W=W)
        out2 = pl.pallas_call(
            kernel,
            out_shape=jax.ShapeDtypeStruct((R, Wout), low_pass.dtype),
            grid=grid,
            in_specs=[pl.BlockSpec((TR, W), lambda i: (i, 0)),
                      pl.BlockSpec((TR, W), lambda i: (i, 0))],
            out_specs=pl.BlockSpec((TR, Wout), lambda i: (i, 0)),
            compiler_params=cparams,
        )(lp2, det2)
    else:
        chunk = min(W, 128)             # one MXU K-tile; helps v5e especially
        wi = jnp.arange(chunk, dtype=jnp.int32)[:, None]
        ji = jnp.arange(2 * chunk, dtype=jnp.int32)[None, :]
        p0 = (ji == 2 * wi).astype(jnp.bfloat16)       # scatter to even lanes
        p1 = (ji == 2 * wi + 1).astype(jnp.bfloat16)   # scatter to odd lanes

        kernel = functools.partial(_haar_interleave_kernel,
                                   lp_mask=lp_mask, sh=sh, W=W,
                                   chunk=chunk, n_split=n_split)
        out2 = pl.pallas_call(
            kernel,
            out_shape=jax.ShapeDtypeStruct((R, Wout), low_pass.dtype),
            grid=grid,
            in_specs=[
                # Scatter matrices: constant block index -> VMEM-resident,
                # never re-fetched / rebuilt inside the grid loop.
                pl.BlockSpec((chunk, 2 * chunk), lambda i: (0, 0)),
                pl.BlockSpec((chunk, 2 * chunk), lambda i: (0, 0)),
                pl.BlockSpec((TR, W), lambda i: (i, 0)),
                pl.BlockSpec((TR, W), lambda i: (i, 0)),
            ],
            out_specs=pl.BlockSpec((TR, Wout), lambda i: (i, 0)),
            compiler_params=cparams,
        )(p0, p1, lp2, det2)

    # (R, sh*sw*W) is byte-identical to NCHW (N, C, sh*H, sw*W): pure reshape,
    # no transpose, no second HBM pass.
    return out2.reshape(N, C, sh * H, sw * W)


# ---------------------------------------------------------------------------
# Module wrapper mirroring the PyTorch class semantics.
# ---------------------------------------------------------------------------
class HaarDeconv2D:
    def __init__(self, orientation, in_channels=3):
        if orientation not in _STRIDES:
            raise ValueError("Unknown orientation: {}".format(orientation))
        self._orientation = orientation
        self._stride = _STRIDES[orientation]
        self._in_channels = in_channels

    def __call__(self, x):
        low_pass = x[LOW_PASS]
        detail = x[DETAIL]
        assert low_pass.shape == detail.shape
        if self._orientation == VERTICAL:
            assert low_pass.shape[2] == low_pass.shape[3] // 2
        elif self._orientation == HORIZONTAL:
            assert low_pass.shape[3] == low_pass.shape[2] // 2
        else:
            assert low_pass.shape[2] == low_pass.shape[3]
        return haar_deconv_pallas(low_pass, detail, self._orientation)


# ---------------------------------------------------------------------------
# Pure-JAX reference (true conv_transpose semantics) for validation.
# ---------------------------------------------------------------------------
def _ref_conv_transpose_depthwise(x, kern2d, stride):
    C = x.shape[1]
    kh, kw = kern2d.shape
    w_fwd = jnp.flip(kern2d, axis=(0, 1))
    w_fwd = jnp.broadcast_to(w_fwd, (C, 1, kh, kw)).astype(x.dtype)
    return lax.conv_general_dilated(
        x, w_fwd,
        window_strides=(1, 1),
        padding=[(kh - 1, kh - 1), (kw - 1, kw - 1)],
        lhs_dilation=stride,
        dimension_numbers=("NCHW", "OIHW", "NCHW"),
        feature_group_count=C,
        precision=lax.Precision.HIGHEST,
    )


def _ref_forward(low_pass, detail, orientation):
    stride = _STRIDES[orientation]
    klow = jnp.array(DECONV_KERNELS[orientation][LOW_PASS], dtype=low_pass.dtype)
    kdet = jnp.array(DECONV_KERNELS[orientation][DETAIL], dtype=low_pass.dtype)
    lp1 = _ref_conv_transpose_depthwise(low_pass, klow, stride)
    d1 = _ref_conv_transpose_depthwise(detail, klow, stride)
    lp2 = _ref_conv_transpose_depthwise(low_pass, kdet, stride)
    d2 = _ref_conv_transpose_depthwise(detail, kdet, stride)
    return lp1 + d1 + lp2 - d2


# ---------------------------------------------------------------------------
if __name__ == "__main__":
    key = jax.random.PRNGKey(0)

    # (orientation, shape, row_tile_override)
    cases = [
        (UP_DIAGONAL, (2, 4, 8, 8), None),       # H == W
        (DOWN_DIAGONAL, (2, 4, 8, 8), None),     # H == W
        (VERTICAL, (2, 4, 8, 16), None),         # H == W // 2
        (HORIZONTAL, (2, 4, 16, 8), None),       # W == H // 2
        # Partial last row-tile (R % TR != 0) coverage:
        (HORIZONTAL, (2, 3, 20, 10), 48),        # R=120, tiles 48/48/24
        (UP_DIAGONAL, (2, 4, 24, 24), 80),       # R=192, tiles 80/80/32
    ]

    ok = True
    for orientation, shape, row_tile in cases:
        key, k1, k2 = jax.random.split(key, 3)
        low_pass = jax.random.normal(k1, shape, dtype=jnp.float32)
        detail = jax.random.normal(k2, shape, dtype=jnp.float32)

        if row_tile is None:
            module = HaarDeconv2D(orientation, in_channels=shape[1])
            out = module((low_pass, detail))
        else:
            out = haar_deconv_pallas(low_pass, detail, orientation,
                                     row_tile=row_tile)
        out = jax.block_until_ready(out)

        ref = jax.block_until_ready(_ref_forward(low_pass, detail, orientation))
        if out.shape != ref.shape or not jnp.allclose(out, ref, atol=1e-5, rtol=1e-5):
            ok = False
            print("MISMATCH for orientation", orientation, "shape", shape)

    if ok:
        print("KERNEL_OK")
</pallas_src>

<mosaic_0001>
module attributes {stable_mosaic.version = 11 : i64} {
  func.func @_haar_interleave_kernel(%arg0: i32, %arg1: memref<8x16xbf16, #tpu.memory_space<vmem>>, %arg2: memref<8x16xbf16, #tpu.memory_space<vmem>>, %arg3: memref<64x8xf32, #tpu.memory_space<vmem>>, %arg4: memref<64x8xf32, #tpu.memory_space<vmem>>, %arg5: memref<64x32xf32, #tpu.memory_space<vmem>>) attributes {dimension_semantics = [#tpu.dimension_semantics<parallel>], iteration_bounds = array<i64: 1>, scalar_prefetch = 0 : i64, scratch_operands = 0 : i64, tpu.core_type = #tpu.core_type<tc>, window_params = [{pipeline_mode = #tpu.pipeline_mode<synchronous>, transform_indices = @transform_0, window_bounds = array<i64: 8, 16>}, {pipeline_mode = #tpu.pipeline_mode<synchronous>, transform_indices = @transform_1, window_bounds = array<i64: 8, 16>}, {transform_indices = @transform_2, window_bounds = array<i64: 64, 8>}, {transform_indices = @transform_3, window_bounds = array<i64: 64, 8>}, {transform_indices = @transform_4, window_bounds = array<i64: 64, 32>}]} {
    %c0 = arith.constant 0 : index
    %c0_0 = arith.constant 0 : index
    %0 = vector.load %arg1[%c0, %c0_0] : memref<8x16xbf16, #tpu.memory_space<vmem>>, vector<8x16xbf16>
    %c0_1 = arith.constant 0 : index
    %c0_2 = arith.constant 0 : index
    %1 = vector.load %arg2[%c0_1, %c0_2] : memref<8x16xbf16, #tpu.memory_space<vmem>>, vector<8x16xbf16>
    %c0_3 = arith.constant 0 : index
    %c0_4 = arith.constant 0 : index
    %2 = vector.load %arg3[%c0_3, %c0_4] : memref<64x8xf32, #tpu.memory_space<vmem>>, vector<64x8xf32>
    %3 = arith.truncf %2 : vector<64x8xf32> to vector<64x8xbf16>
    %4 = arith.extf %3 : vector<64x8xbf16> to vector<64x8xf32>
    %5 = arith.subf %2, %4 : vector<64x8xf32>
    %6 = arith.truncf %5 : vector<64x8xf32> to vector<64x8xbf16>
    %7 = arith.extf %6 : vector<64x8xbf16> to vector<64x8xf32>
    %8 = arith.subf %5, %7 : vector<64x8xf32>
    %9 = arith.truncf %8 : vector<64x8xf32> to vector<64x8xbf16>
    %c0_5 = arith.constant 0 : index
    %c0_6 = arith.constant 0 : index
    %10 = vector.load %arg4[%c0_5, %c0_6] : memref<64x8xf32, #tpu.memory_space<vmem>>, vector<64x8xf32>
    %11 = arith.truncf %10 : vector<64x8xf32> to vector<64x8xbf16>
    %12 = arith.extf %11 : vector<64x8xbf16> to vector<64x8xf32>
    %13 = arith.subf %10, %12 : vector<64x8xf32>
    %14 = arith.truncf %13 : vector<64x8xf32> to vector<64x8xbf16>
    %15 = arith.extf %14 : vector<64x8xbf16> to vector<64x8xf32>
    %16 = arith.subf %13, %15 : vector<64x8xf32>
    %17 = arith.truncf %16 : vector<64x8xf32> to vector<64x8xbf16>
    %cst = arith.constant dense<0.000000e+00> : vector<64x16xf32>
    %18 = tpu.matmul %3, %0, %cst {dimension_numbers = #tpu.dot_dimension_numbers<[1], [0], [0], [1], [0, 0, 1, 1], [], []>} : vector<64x8xbf16>, vector<8x16xbf16>, vector<64x16xf32> -> vector<64x16xf32>
    %cst_7 = arith.constant dense<0.000000e+00> : vector<64x16xf32>
    %19 = tpu.matmul %6, %0, %cst_7 {dimension_numbers = #tpu.dot_dimension_numbers<[1], [0], [0], [1], [0, 0, 1, 1], [], []>} : vector<64x8xbf16>, vector<8x16xbf16>, vector<64x16xf32> -> vector<64x16xf32>
    %20 = arith.addf %18, %19 : vector<64x16xf32>
    %cst_8 = arith.constant dense<0.000000e+00> : vector<64x16xf32>
    %21 = tpu.matmul %9, %0, %cst_8 {dimension_numbers = #tpu.dot_dimension_numbers<[1], [0], [0], [1], [0, 0, 1, 1], [], []>} : vector<64x8xbf16>, vector<8x16xbf16>, vector<64x16xf32> -> vector<64x16xf32>
    %22 = arith.addf %20, %21 : vector<64x16xf32>
    %cst_9 = arith.constant dense<0.000000e+00> : vector<64x16xf32>
    %23 = tpu.matmul %11, %1, %cst_9 {dimension_numbers = #tpu.dot_dimension_numbers<[1], [0], [0], [1], [0, 0, 1, 1], [], []>} : vector<64x8xbf16>, vector<8x16xbf16>, vector<64x16xf32> -> vector<64x16xf32>
    %24 = arith.addf %22, %23 : vector<64x16xf32>
    %cst_10 = arith.constant dense<0.000000e+00> : vector<64x16xf32>
    %25 = tpu.matmul %14, %1, %cst_10 {dimension_numbers = #tpu.dot_dimension_numbers<[1], [0], [0], [1], [0, 0, 1, 1], [], []>} : vector<64x8xbf16>, vector<8x16xbf16>, vector<64x16xf32> -> vector<64x16xf32>
    %26 = arith.addf %24, %25 : vector<64x16xf32>
    %cst_11 = arith.constant dense<0.000000e+00> : vector<64x16xf32>
    %27 = tpu.matmul %17, %1, %cst_11 {dimension_numbers = #tpu.dot_dimension_numbers<[1], [0], [0], [1], [0, 0, 1, 1], [], []>} : vector<64x8xbf16>, vector<8x16xbf16>, vector<64x16xf32> -> vector<64x16xf32>
    %28 = arith.addf %26, %27 : vector<64x16xf32>
    %c0_12 = arith.constant 0 : index
    %c0_13 = arith.constant 0 : index
    %29 = vector.load %arg5[%c0_12, %c0_13] : memref<64x32xf32, #tpu.memory_space<vmem>>, vector<64x16xf32>
    tpu.vector_store %arg5[%c0_12, %c0_13], %28 {strides = array<i32>} : memref<64x32xf32, #tpu.memory_space<vmem>>, vector<64x16xf32>,
    %cst_14 = arith.constant dense<0.000000e+00> : vector<64x16xf32>
    %30 = tpu.matmul %11, %0, %cst_14 {dimension_numbers = #tpu.dot_dimension_numbers<[1], [0], [0], [1], [0, 0, 1, 1], [], []>} : vector<64x8xbf16>, vector<8x16xbf16>, vector<64x16xf32> -> vector<64x16xf32>
    %cst_15 = arith.constant dense<0.000000e+00> : vector<64x16xf32>
    %31 = tpu.matmul %14, %0, %cst_15 {dimension_numbers = #tpu.dot_dimension_numbers<[1], [0], [0], [1], [0, 0, 1, 1], [], []>} : vector<64x8xbf16>, vector<8x16xbf16>, vector<64x16xf32> -> vector<64x16xf32>
    %32 = arith.addf %30, %31 : vector<64x16xf32>
    %cst_16 = arith.constant dense<0.000000e+00> : vector<64x16xf32>
    %33 = tpu.matmul %17, %0, %cst_16 {dimension_numbers = #tpu.dot_dimension_numbers<[1], [0], [0], [1], [0, 0, 1, 1], [], []>} : vector<64x8xbf16>, vector<8x16xbf16>, vector<64x16xf32> -> vector<64x16xf32>
    %34 = arith.addf %32, %33 : vector<64x16xf32>
    %cst_17 = arith.constant dense<0.000000e+00> : vector<64x16xf32>
    %35 = tpu.matmul %3, %1, %cst_17 {dimension_numbers = #tpu.dot_dimension_numbers<[1], [0], [0], [1], [0, 0, 1, 1], [], []>} : vector<64x8xbf16>, vector<8x16xbf16>, vector<64x16xf32> -> vector<64x16xf32>
    %36 = arith.addf %34, %35 : vector<64x16xf32>
    %cst_18 = arith.constant dense<0.000000e+00> : vector<64x16xf32>
    %37 = tpu.matmul %6, %1, %cst_18 {dimension_numbers = #tpu.dot_dimension_numbers<[1], [0], [0], [1], [0, 0, 1, 1], [], []>} : vector<64x8xbf16>, vector<8x16xbf16>, vector<64x16xf32> -> vector<64x16xf32>
    %38 = arith.addf %36, %37 : vector<64x16xf32>
    %cst_19 = arith.constant dense<0.000000e+00> : vector<64x16xf32>
    %39 = tpu.matmul %9, %1, %cst_19 {dimension_numbers = #tpu.dot_dimension_numbers<[1], [0], [0], [1], [0, 0, 1, 1], [], []>} : vector<64x8xbf16>, vector<8x16xbf16>, vector<64x16xf32> -> vector<64x16xf32>
    %40 = arith.addf %38, %39 : vector<64x16xf32>
    %c0_20 = arith.constant 0 : index
    %c16 = arith.constant 16 : index
    %41 = vector.load %arg5[%c0_20, %c16] : memref<64x32xf32, #tpu.memory_space<vmem>>, vector<64x16xf32>
    tpu.vector_store %arg5[%c0_20, %c16], %40 {strides = array<i32>} : memref<64x32xf32, #tpu.memory_space<vmem>>, vector<64x16xf32>,
    return
  }
  func.func @transform_0(%arg0: i32) -> (i32, i32) {
    %c0_i32 = arith.constant 0 : i32
    %c0_i32_0 = arith.constant 0 : i32
    %c0_i32_1 = arith.constant 0 : i32
    return %c0_i32, %c0_i32_0 : i32, i32
  }
  func.func @transform_1(%arg0: i32) -> (i32, i32) {
    %c0_i32 = arith.constant 0 : i32
    %c0_i32_0 = arith.constant 0 : i32
    %c0_i32_1 = arith.constant 0 : i32
    return %c0_i32, %c0_i32_0 : i32, i32
  }
  func.func @transform_2(%arg0: i32) -> (i32, i32) {
    %c0_i32 = arith.constant 0 : i32
    %c0_i32_0 = arith.constant 0 : i32
    return %arg0, %c0_i32 : i32, i32
  }
  func.func @transform_3(%arg0: i32) -> (i32, i32) {
    %c0_i32 = arith.constant 0 : i32
    %c0_i32_0 = arith.constant 0 : i32
    return %arg0, %c0_i32 : i32, i32
  }
  func.func @transform_4(%arg0: i32) -> (i32, i32) {
    %c0_i32 = arith.constant 0 : i32
    %c0_i32_0 = arith.constant 0 : i32
    return %arg0, %c0_i32 : i32, i32
  }
}

</mosaic_0001>

<bundles_post_ra>
// kernel: tpu_custom_call.1
= control target key start
LH: loop header
LB: loop body
LE: loop exit
PB: predicated region body
PF: predicated region fallthrough
CT: control target
= control target key end

     0   :  { %vm173_vm0 = vcmask 1043456   ;;  %vm160_vm1 = vcmask 64512   ;;  %vm506_vm2 = vcmask 130048   ;;  %s815_s9 = smov 16   ;;  %vm753_vm3 = vcmask 261248   ;;  %s1247_s1 = inlined_call_operand.vmem [shape: bf16[8,16], index: 1, kind: input, shape index: {}]   ;;  %s1248_s0 = inlined_call_operand.vmem [shape: bf16[8,16], index: 0, kind: input, shape index: {}]   ;;  %s1249_s3 = inlined_call_operand.vmem [shape: f32[64,8], index: 3, kind: input, shape index: {}]   ;;  %s1250_s2 = inlined_call_operand.vmem [shape: f32[64,8], index: 2, kind: input, shape index: {}]   ;;  %s1251_s4 = inlined_call_operand.vmem [shape: f32[64,32], index: 4, kind: output, shape index: {}]  }
   0x1   :  { %v19_v0 = vld [vmem:[%s1247_s1] sm:$0xf]  ;;  %v857_v5 = vld [vmem:[%s1249_s3 + $0x8] sm:$0xff]  ;;  %v22_v16 = vld [vmem:[%s1250_s2 + $0x10] sm:$0xff] }
   0x2   :  { %v18_v1 = vld [vmem:[%s1248_s0] sm:$0xf]  ;;  %v852_v3 = vsel %vm173_vm0, %v19_v0, 0  ;;  %v21_v8 = vld [vmem:[%s1250_s2 + $0x8] sm:$0xff]  ;;  %v872_v9 = vpack.c.bf16 %v857_v5, %v857_v5  ;;  %v23_v19 = vld [vmem:[%s1250_s2 + $0x18] sm:$0xff]  ;;  %v30_v24 = vpack.c.bf16 %v22_v16, %v22_v16 }
   0x3   :  { %v850_v2 = vld [vmem:[%s1249_s3] sm:$0xff]  ;;  %v175_v4 = vsel %vm173_vm0, %v18_v1, 0  ;;  %358 = vmatpush.bf16.msra.mxu3 %v852_v3  ;;  %v29_v11 = vpack.c.bf16 %v21_v8, %v21_v8  ;;  %v893_v27 = vld [vmem:[%s1249_s3 + $0x10] sm:$0xff]  ;;  %v898_v28 = vld [vmem:[%s1249_s3 + $0x18] sm:$0xff]  ;;  %v31_v29 = vpack.c.bf16 %v23_v19, %v23_v19 }
   0x4   :  { %v861_v6 = vpack.c.bf16 %v850_v2, %v850_v2  ;;  %v20_v7 = vld [vmem:[%s1250_s2] sm:$0xff]  ;;  %245 = vmatpush.bf16.msra.mxu1 %v175_v4  ;;  %184 = vmatpush.bf16.msra.mxu0 %v175_v4  ;;  %v325_v13 = vunpack.c.l.b16 %v872_v9  ;;  %v38_v30 = vunpack.c.l.bf16 %v30_v24  ;;  %v906_v35 = vpack.c.bf16 %v893_v27, %v893_v27  ;;  %v25_v51 = vld [vmem:[%s1250_s2 + $0x28] sm:$0xff] }
   0x5   :  { %v28_v10 = vpack.c.bf16 %v20_v7, %v20_v7  ;;  %286 = vmatpush.bf16.msra.mxu2 %v175_v4  ;;  %v37_v15 = vunpack.c.l.bf16 %v29_v11  ;;  %v215_v18 = vunpack.c.l.b16 %v29_v11  ;;  %v910_v36 = vpack.c.bf16 %v898_v28, %v898_v28  ;;  %v24_v50 = vld [vmem:[%s1250_s2 + $0x20] sm:$0xff]  ;;  %v943_v63 = vld [vmem:[%s1249_s3 + $0x28] sm:$0xff] }
   0x6   :  { %v324_v12 = vunpack.c.l.b16 %v861_v6  ;;  %v39_v37 = vunpack.c.l.bf16 %v31_v29  ;;  %v46_v41 = vsub.f32 %v22_v16, %v38_v30  ;;  %v326_v44 = vunpack.c.l.b16 %v906_v35  ;;  %v938_v62 = vld [vmem:[%s1249_s3 + $0x20] sm:$0xff] }
   0x7   :  { %v36_v14 = vunpack.c.l.bf16 %v28_v10  ;;  %v214_v17 = vunpack.c.l.b16 %v28_v10  ;;  %551 = vmatpush.bf16.msrb.mxu3 %v175_v4  ;;  %v45_v22 = vsub.f32 %v21_v8, %v37_v15  ;;  %v327_v45 = vunpack.c.l.b16 %v910_v36 }
   0x8   :  { %427 = vmatpush.bf16.msrb.mxu0 %v852_v3  ;;  %476 = vmatpush.bf16.msrb.mxu1 %v852_v3  ;;  %v884_v20 = vpack.c.b16 %v325_v13, %v324_v12  ;;  %v47_v42 = vsub.f32 %v23_v19, %v39_v37  ;;  %v54_v46 = vpack.c.bf16 %v46_v41, %v46_v41  ;;  %v216_v48 = vunpack.c.l.b16 %v30_v24  ;;  %v27_v19 = vld [vmem:[%s1250_s2 + $0x38] sm:$0xff] }
   0x9   :  { %522 = vmatpush.bf16.msrb.mxu2 %v175_v4  ;;  %v44_v21 = vsub.f32 %v20_v7, %v36_v14  ;;  %v886_v23 = vpack.c.b16 %v215_v18, %v214_v17  ;;  %v53_v26 = vpack.c.bf16 %v45_v22, %v45_v22  ;;  %v217_v49 = vunpack.c.l.b16 %v31_v29  ;;  %v26_v18 = vld [vmem:[%s1250_s2 + $0x30] sm:$0xff] }
   0xa   :  { %778 = vmatmul.msk.bf16.vlgmr.msra.gmra.mxu3 %vm160_vm1, %v884_v20  ;;  %v55_v47 = vpack.c.bf16 %v47_v42, %v47_v42  ;;  %v929_v52 = vpack.c.b16 %v327_v45, %v326_v44  ;;  %v62_v53 = vunpack.c.l.bf16 %v54_v46  ;;  %v32_v55 = vpack.c.bf16 %v24_v50, %v24_v50 }
   0xb   :  { %v52_v25 = vpack.c.bf16 %v44_v21, %v44_v21  ;;  %770 = vmatmul.msk.bf16.vlgmr.msra.gmra.mxu1 %vm160_vm1, %v886_v23  ;;  %691 = vmatpush.bf16.msra.mxu3 %v852_v3  ;;  %v149_v32 = vunpack.c.l.b16 %v53_v26  ;;  %v61_v34 = vunpack.c.l.bf16 %v53_v26  ;;  %v33_v56 = vpack.c.bf16 %v25_v51, %v25_v51 }
   0xc   :  { %617 = vmatpush.bf16.msra.mxu1 %v852_v3  ;;  %v63_v54 = vunpack.c.l.bf16 %v55_v47  ;;  %v931_v57 = vpack.c.b16 %v217_v49, %v216_v48  ;;  %v150_v58 = vunpack.c.l.b16 %v54_v46  ;;  %v151_v59 = vunpack.c.l.b16 %v55_v47 }
   0xd   :  { %v148_v31 = vunpack.c.l.b16 %v52_v25  ;;  %v60_v33 = vunpack.c.l.bf16 %v52_v25  ;;  %v69_v40 = vsub.f32 %v45_v22, %v61_v34  ;;  %v70_v60 = vsub.f32 %v46_v41, %v62_v53  ;;  %v980_v34 = vld [vmem:[%s1249_s3 + $0x30] sm:$0xff] }
   0xe   :  { %v71_v61 = vsub.f32 %v47_v42, %v63_v54  ;;  %v40_v0 = vunpack.c.l.bf16 %v32_v55  ;;  %v41_v1 = vunpack.c.l.bf16 %v33_v56  ;;  %v955_v7 = vpack.c.bf16 %v943_v63, %v943_v63 }
   0xf   :  { %v912_v38 = vpack.c.b16 %v149_v32, %v148_v31  ;;  %v68_v39 = vsub.f32 %v44_v21, %v60_v33  ;;  %v218_v16 = vunpack.c.l.b16 %v32_v55  ;;  %v219_v17 = vunpack.c.l.b16 %v33_v56 }
  0x10   :  { %v957_v8 = vpack.c.bf16 %v71_v61, %v70_v60  ;;  %v48_v10 = vsub.f32 %v24_v50, %v40_v0  ;;  %v49_v11 = vsub.f32 %v25_v51, %v41_v1  ;;  %v329_v13 = vunpack.c.l.b16 %v955_v7 }
  0x11   :  { %766 = vmatmul.msk.bf16.vlgmr.msra.gmra.mxu0 %vm160_vm1, %v912_v38  ;;  %v916_v43 = vpack.c.bf16 %v69_v40, %v68_v39  ;;  %v34_v25 = vpack.c.bf16 %v26_v18, %v26_v18  ;;  %v35_v26 = vpack.c.bf16 %v27_v19, %v27_v19  ;;  %v973_v29 = vpack.c.b16 %v219_v17, %v218_v16  ;;  %v987_v40 = vld [vmem:[%s1249_s3 + $0x38] sm:$0xff] }
  0x12   :  { %580 = vmatpush.bf16.msra.mxu0 %v175_v4  ;;  %v951_v4 = vpack.c.bf16 %v938_v62, %v938_v62  ;;  %v56_v14 = vpack.c.bf16 %v48_v10, %v48_v10  ;;  %v57_v15 = vpack.c.bf16 %v49_v11, %v49_v11  ;;  %v993_v42 = vpack.c.bf16 %v980_v34, %v980_v34 }
  0x13   :  { %774 = vmatmul.msk.bf16.vlgmr.msra.gmra.mxu2 %vm160_vm1, %v916_v43  ;;  %v42_v37 = vunpack.c.l.bf16 %v34_v25  ;;  %v43_v39 = vunpack.c.l.bf16 %v35_v26  ;;  %v999_v45 = vpack.c.bf16 %v987_v40, %v987_v40  ;;  %v96_v53 = vunpack.c.l.bf16 %v861_v6 }
  0x14   :  { %654 = vmatpush.bf16.msra.mxu2 %v852_v3  ;;  %v947_v3 = vpack.c.b16 %v151_v59, %v150_v58  ;;  %v328_v12 = vunpack.c.l.b16 %v951_v4  ;;  %v64_v22 = vunpack.c.l.bf16 %v56_v14  ;;  %v65_v24 = vunpack.c.l.bf16 %v57_v15 }
  0x15   :  { %v152_v30 = vunpack.c.l.b16 %v56_v14  ;;  %v153_v31 = vunpack.c.l.b16 %v57_v15  ;;  %v50_v46 = vsub.f32 %v26_v18, %v42_v37  ;;  %v51_v47 = vsub.f32 %v27_v19, %v43_v39 }
  0x16   :  { %v971_v21 = vpack.c.b16 %v329_v13, %v328_v12  ;;  %v72_v32 = vsub.f32 %v48_v10, %v64_v22  ;;  %v73_v33 = vsub.f32 %v49_v11, %v65_v24  ;;  %v330_v48 = vunpack.c.l.b16 %v993_v42 }
  0x17   :  { %v989_v41 = vpack.c.b16 %v153_v31, %v152_v30  ;;  %v331_v49 = vunpack.c.l.b16 %v999_v45  ;;  %v58_v50 = vpack.c.bf16 %v50_v46, %v50_v46  ;;  %v59_v51 = vpack.c.bf16 %v51_v47, %v51_v47 }
  0x18   :  { %v995_v44 = vpack.c.bf16 %v73_v33, %v72_v32  ;;  %v97_v54 = vunpack.c.l.bf16 %v872_v9  ;;  %v220_v55 = vunpack.c.l.b16 %v34_v25  ;;  %v221_v56 = vunpack.c.l.b16 %v35_v26 }
  0x19   :  { %v1009_v58 = vpack.c.b16 %v331_v49, %v330_v48  ;;  %v66_v59 = vunpack.c.l.bf16 %v58_v50  ;;  %v67_v60 = vunpack.c.l.bf16 %v59_v51  ;;  %v104_v61 = vsub.f32 %v850_v2, %v96_v53 }
  0x1a   :  { %779 = vmatmul.msk.bf16.gmra.mxu3 %vm160_vm1, %v929_v52  ;;  %v105_v0 = vsub.f32 %v857_v5, %v97_v54  ;;  %v1013_v1 = vpack.c.b16 %v221_v56, %v220_v55  ;;  %v154_v10 = vunpack.c.l.b16 %v58_v50  ;;  %v155_v11 = vunpack.c.l.b16 %v59_v51 }
  0x1b   :  { %771 = vmatmul.msk.bf16.gmra.mxu1 %vm160_vm1, %v931_v57  ;;  %v74_v6 = vsub.f32 %v50_v46, %v66_v59  ;;  %v75_v12 = vsub.f32 %v51_v47, %v67_v60  ;;  %v112_v9 = vpack.c.bf16 %v104_v61, %v104_v61  ;;  %v98_v18 = vunpack.c.l.bf16 %v906_v35 }
  0x1c   :  { %v113_v13 = vpack.c.bf16 %v105_v0, %v105_v0  ;;  %v1019_v14 = vpack.c.b16 %v155_v11, %v154_v10  ;;  %v99_v19 = vunpack.c.l.bf16 %v910_v36  ;;  %v101_v39 = vunpack.c.l.bf16 %v955_v7 }
  0x1d   :  { %v1021_v15 = vpack.c.bf16 %v75_v12, %v74_v6  ;;  %v120_v2 = vunpack.c.l.bf16 %v112_v9  ;;  %v106_v24 = vsub.f32 %v893_v27, %v98_v18  ;;  %v396_v26 = vunpack.c.l.b16 %v112_v9 }
  0x1e   :  { %v121_v5 = vunpack.c.l.bf16 %v113_v13  ;;  %v107_v25 = vsub.f32 %v898_v28, %v99_v19  ;;  %v397_v30 = vunpack.c.l.b16 %v113_v13  ;;  %v100_v28 = vunpack.c.l.bf16 %v951_v4 }
  0x1f   :  { %v128_v16 = vsub.f32 %v104_v61, %v120_v2  ;;  %v114_v31 = vpack.c.bf16 %v106_v24, %v106_v24  ;;  %v109_v47 = vsub.f32 %v943_v63, %v101_v39  ;;  %v102_v63 = vunpack.c.l.bf16 %v993_v42 }
  0x20   :  { %v129_v17 = vsub.f32 %v105_v0, %v121_v5  ;;  %v115_v32 = vpack.c.bf16 %v107_v25, %v107_v25  ;;  %v404_v33 = vpack.c.b16 %v397_v30, %v396_v26  ;;  %v103_v7 = vunpack.c.l.bf16 %v999_v45 }
  0x21   :  { %767 = vmatmul.msk.bf16.gmra.mxu0 %vm160_vm1, %v947_v3  ;;  %v122_v35 = vunpack.c.l.bf16 %v114_v31  ;;  %v398_v48 = vunpack.c.l.b16 %v114_v31  ;;  %v117_v51 = vpack.c.bf16 %v109_v47, %v109_v47 }
  0x22   :  { %v1029_v22 = vpack.c.bf16 %v129_v17, %v128_v16  ;;  %v123_v37 = vunpack.c.l.bf16 %v115_v32  ;;  %v399_v49 = vunpack.c.l.b16 %v115_v32  ;;  %v111_v59 = vsub.f32 %v987_v40, %v103_v7 }
  0x23   :  { %775 = vmatmul.msk.bf16.gmra.mxu2 %vm160_vm1, %v957_v8  ;;  %v130_v27 = vsub.f32 %v106_v24, %v122_v35  ;;  %v125_v55 = vunpack.c.l.bf16 %v117_v51  ;;  %v401_v61 = vunpack.c.l.b16 %v117_v51 }
  0x24   :  { %v131_v36 = vsub.f32 %v107_v25, %v123_v37  ;;  %v405_v53 = vpack.c.b16 %v399_v49, %v398_v48  ;;  %v119_v10 = vpack.c.bf16 %v111_v59, %v111_v59 }
  0x26   :  { %v137_v46 = vpack.c.bf16 %v131_v36, %v130_v27  ;;  %v127_v12 = vunpack.c.l.bf16 %v119_v10  ;;  %v403_v9 = vunpack.c.l.b16 %v119_v10 }
  0x2a   :  { %780 = vmatmul.msk.bf16.gmra.mxu3 %vm160_vm1, %v971_v21 }
  0x2b   :  { %772 = vmatmul.msk.bf16.gmra.mxu1 %vm160_vm1, %v973_v29 }
  0x31   :  { %768 = vmatmul.msk.bf16.gmra.mxu0 %vm160_vm1, %v989_v41 }
  0x33   :  { %776 = vmatmul.msk.bf16.gmra.mxu2 %vm160_vm1, %v995_v44 }
  0x3a   :  { %781 = vmatmul.msk.bf16.gmra.mxu3 %vm160_vm1, %v1009_v58 }
  0x3b   :  { %773 = vmatmul.msk.bf16.gmra.mxu1 %vm160_vm1, %v1013_v1 }
  0x41   :  { %769 = vmatmul.msk.bf16.gmra.mxu0 %vm160_vm1, %v1019_v14 }
  0x43   :  { %777 = vmatmul.msk.bf16.gmra.mxu2 %vm160_vm1, %v1021_v15 }
  0x4a   :  { %794 = vmatmul.msk.bf16.vlgmr.msrb.gmra.mxu3 %vm160_vm1, %v884_v20  ;;  %v108_v20 = vsub.f32 %v938_v62, %v100_v28  ;;  %v133_v62 = vsub.f32 %v109_v47, %v125_v55 }
  0x4b   :  { %786 = vmatmul.msk.bf16.vlgmr.msrb.gmra.mxu1 %vm160_vm1, %v1029_v22 }
  0x4c   :  { %v116_v50 = vpack.c.bf16 %v108_v20, %v108_v20 }
  0x4e   :  { %v124_v54 = vunpack.c.l.bf16 %v116_v50  ;;  %v400_v60 = vunpack.c.l.b16 %v116_v50 }
  0x50   :  { %v132_v4 = vsub.f32 %v108_v20, %v124_v54  ;;  %v406_v11 = vpack.c.b16 %v401_v61, %v400_v60 }
  0x51   :  { %782 = vmatmul.msk.bf16.vlgmr.msrb.gmra.mxu0 %vm160_vm1, %v404_v33 }
  0x52   :  { %v138_v56 = vpack.c.bf16 %v133_v62, %v132_v4 }
  0x53   :  { %790 = vmatmul.msk.bf16.vlgmr.msrb.gmra.mxu2 %vm160_vm1, %v404_v33 }
  0x5a   :  { %795 = vmatmul.msk.bf16.gmra.mxu3 %vm160_vm1, %v929_v52  ;;  %v110_v52 = vsub.f32 %v980_v34, %v102_v63  ;;  %v135_v34 = vsub.f32 %v111_v59, %v127_v12 }
  0x5b   :  { %787 = vmatmul.msk.bf16.gmra.mxu1 %vm160_vm1, %v137_v46 }
  0x5c   :  { %v118_v0 = vpack.c.bf16 %v110_v52, %v110_v52 }
  0x5e   :  { %v126_v6 = vunpack.c.l.bf16 %v118_v0  ;;  %v402_v40 = vunpack.c.l.b16 %v118_v0 }
  0x60   :  { %v134_v42 = vsub.f32 %v110_v52, %v126_v6 }
  0x61   :  { %783 = vmatmul.msk.bf16.gmra.mxu0 %vm160_vm1, %v405_v53 }
  0x62   :  { %v139_v45 = vpack.c.bf16 %v135_v34, %v134_v42 }
  0x63   :  { %791 = vmatmul.msk.bf16.gmra.mxu2 %vm160_vm1, %v405_v53 }
  0x6a   :  { %796 = vmatmul.msk.bf16.gmra.mxu3 %vm160_vm1, %v971_v21  ;;  %v407_v21 = vpack.c.b16 %v403_v9, %v402_v40 }
  0x6b   :  { %788 = vmatmul.msk.bf16.gmra.mxu1 %vm160_vm1, %v138_v56 }
  0x71   :  { %784 = vmatmul.msk.bf16.gmra.mxu0 %vm160_vm1, %v406_v11 }
  0x73   :  { %792 = vmatmul.msk.bf16.gmra.mxu2 %vm160_vm1, %v406_v11 }
  0x7a   :  { %797 = vmatmul.msk.bf16.gmra.mxu3 %vm160_vm1, %v1009_v58 }
  0x7b   :  { %789 = vmatmul.msk.bf16.gmra.mxu1 %vm160_vm1, %v139_v45 }
  0x81   :  { %785 = vmatmul.msk.bf16.gmra.mxu0 %vm160_vm1, %v407_v21 }
  0x83   :  { %793 = vmatmul.msk.bf16.gmra.mxu2 %vm160_vm1, %v407_v21 }
  0x88   :  { %v247_v13 = vpop.f32.mrf.mxu1 }
  0x8a   :  { %810 = vmatmul.msk.bf16.vlgmr.msra.gmra.mxu3 %vm160_vm1, %v916_v43 }
  0x8b   :  { %802 = vmatmul.msk.bf16.vlgmr.msra.gmra.mxu1 %vm160_vm1, %v886_v23 }
  0x8d   :  { %v360_v5 = vpop.f32.mrf.mxu3 }
  0x8e   :  { %v186_v2 = vpop.f32.mrf.mxu0 }
  0x90   :  { %v249_v58 = vpop.f32.mrf.mxu1 }
  0x91   :  { %798 = vmatmul.msk.bf16.vlgmr.msra.gmra.mxu0 %vm160_vm1, %v1029_v22 }
  0x93   :  { %806 = vmatmul.msk.bf16.vlgmr.msra.gmra.mxu2 %vm160_vm1, %v912_v38 }
  0x95   :  { %v362_v18 = vpop.f32.mrf.mxu3 }
  0x96   :  { %v188_v16 = vpop.f32.mrf.mxu0  ;;  %v288_v17 = vpop.f32.mrf.mxu2 }
  0x97   :  { %v250_v49 = vadd.f32 %v249_v58, %v188_v16 }
  0x98   :  { %v252_v19 = vpop.f32.mrf.mxu1 }
  0x9a   :  { %811 = vmatmul.msk.bf16.gmra.mxu3 %vm160_vm1, %v957_v8 }
  0x9b   :  { %803 = vmatmul.msk.bf16.gmra.mxu1 %vm160_vm1, %v931_v57 }
  0x9d   :  { %v365_v24 = vpop.f32.mrf.mxu3 }
  0x9e   :  { %v191_v23 = vpop.f32.mrf.mxu0  ;;  %v290_v43 = vpop.f32.mrf.mxu2 }
  0x9f   :  { %v309_v53 = vadd.f32 %v290_v43, %v250_v49  ;;  %v253_v63 = vadd.f32 %v252_v19, %v191_v23 }
  0xa0   :  { %v254_v22 = vpop.f32.mrf.mxu1 }
  0xa1   :  { %799 = vmatmul.msk.bf16.gmra.mxu0 %vm160_vm1, %v137_v46  ;;  %v381_v55 = vadd.f32 %v362_v18, %v309_v53 }
  0xa3   :  { %807 = vmatmul.msk.bf16.gmra.mxu2 %vm160_vm1, %v947_v3 }
  0xa5   :  { %v367_v26 = vpop.f32.mrf.mxu3 }
  0xa6   :  { %v193_v38 = vpop.f32.mrf.mxu0  ;;  %v293_v25 = vpop.f32.mrf.mxu2 }
  0xa7   :  { %v310_v52 = vadd.f32 %v293_v25, %v253_v63  ;;  %v255_v11 = vadd.f32 %v254_v22, %v193_v38 }
  0xa8   :  { %v257_v30 = vpop.f32.mrf.mxu1 }
  0xa9   :  { %v382_v61 = vadd.f32 %v365_v24, %v310_v52 }
  0xaa   :  { %812 = vmatmul.msk.bf16.gmra.mxu3 %vm160_vm1, %v995_v44 }
  0xab   :  { %804 = vmatmul.msk.bf16.gmra.mxu1 %vm160_vm1, %v973_v29 }
  0xad   :  { %v1081_v31 = vpop.f32.mrf.mxu3 }
  0xae   :  { %v196_v57 = vpop.f32.mrf.mxu0  ;;  %v295_v8 = vpop.f32.mrf.mxu2 }
  0xaf   :  { %v311_v42 = vadd.f32 %v295_v8, %v255_v11 }
  0xb0   :  { %v1084_v32 = vpop.f32.mrf.mxu1 }
  0xb1   :  { %800 = vmatmul.msk.bf16.gmra.mxu0 %vm160_vm1, %v138_v56  ;;  %v383_v40 = vadd.f32 %v367_v26, %v311_v42 }
  0xb3   :  { %808 = vmatmul.msk.bf16.gmra.mxu2 %vm160_vm1, %v989_v41 }
  0xb5   :  { %v1090_v35 = vpop.f32.mrf.mxu3 }
  0xb6   :  { %v1088_v3 = vpop.f32.mrf.mxu0  ;;  %v298_v33 = vpop.f32.mrf.mxu2 }
  0xb7   :  { %v260_v43 = vadd.f32 %v1084_v32, %v1088_v3 }
  0xb8   :  { %v1092_v44 = vpop.f32.mrf.mxu1 }
  0xba   :  { %813 = vmatmul.msk.bf16.gmra.mxu3 %vm160_vm1, %v1021_v15  ;;  %v248_v15 = vadd.f32 %v247_v13, %v186_v2  ;;  %v258_v13 = vadd.f32 %v257_v30, %v196_v57 }
  0xbb   :  { %805 = vmatmul.msk.bf16.gmra.mxu1 %vm160_vm1, %v1013_v1 }
  0xbc   :  { %v308_v1 = vadd.f32 %v288_v17, %v248_v15  ;;  %v312_v58 = vadd.f32 %v298_v33, %v258_v13 }
  0xbd   :  { %v1100_v27 = vpop.f32.mrf.mxu3 }
  0xbe   :  { %v1098_v29 = vpop.f32.mrf.mxu0  ;;  %v300_v37 = vpop.f32.mrf.mxu2  ;;  %v380_v20 = vadd.f32 %v360_v5, %v308_v1  ;;  %v384_v18 = vadd.f32 %v1081_v31, %v312_v58 }
  0xbf   :  { %v313_v38 = vadd.f32 %v300_v37, %v260_v43  ;;  %v263_v31 = vadd.f32 %v1092_v44, %v1098_v29 }
  0xc0   :  { %v1103_v41 = vpop.f32.mrf.mxu1 }
  0xc1   :  { %801 = vmatmul.msk.bf16.gmra.mxu0 %vm160_vm1, %v139_v45  ;;  %v385_v30 = vadd.f32 %v1090_v35, %v313_v38 }
  0xc3   :  { %809 = vmatmul.msk.bf16.gmra.mxu2 %vm160_vm1, %v1019_v14 }
  0xc5   :  { %v1111_v39 = vpop.f32.mrf.mxu3 }
  0xc6   :  { %v1107_v36 = vpop.f32.mrf.mxu0  ;;  %v1109_v28 = vpop.f32.mrf.mxu2 }
  0xc7   :  { %v314_v33 = vadd.f32 %v1109_v28, %v263_v31  ;;  %v265_v44 = vadd.f32 %v1103_v41, %v1107_v36 }
  0xc8   :  { %v478_v46 = vpop.f32.mrf.mxu1 }
  0xc9   :  { %v386_v35 = vadd.f32 %v1100_v27, %v314_v33 }
  0xcd   :  { %v1115_v51 = vpop.f32.mrf.mxu3 }
  0xce   :  { %v1113_v47 = vpop.f32.mrf.mxu2  ;;  %v429_v48 = vpop.f32.mrf.mxu0 }
  0xcf   :  { %v449_v50 = vadd.f32 %v429_v48, %v380_v20  ;;  %v315_v28 = vadd.f32 %v1113_v47, %v265_v44 }
  0xd0   :  { %v480_v54 = vpop.f32.mrf.mxu1 }
  0xd1   :  { %v498_v14 = vadd.f32 %v478_v46, %v449_v50  ;;  %v387_v27 = vadd.f32 %v1111_v39, %v315_v28 }
  0xd3   :  { %507 = vst.msk [vmem:[%s1251_s4] sm:$0xff] %vm506_vm2, %v498_v14 }
  0xd5   :  { %v1123_v56 = vpop.f32.mrf.mxu3 }
  0xd6   :  { %v431_v4 = vpop.f32.mrf.mxu0  ;;  %v1121_v62 = vpop.f32.mrf.mxu2 }
  0xd7   :  { %v450_v7 = vadd.f32 %v431_v4, %v381_v55  ;;  %v554_v4 = vadd.f32 %v1115_v51, %v1121_v62 }
  0xd8   :  { %v483_v60 = vpop.f32.mrf.mxu1 }
  0xd9   :  { %v499_v59 = vadd.f32 %v480_v54, %v450_v7 }
  0xdb   :  { %508 = vst.msk [vmem:[%s1251_s4 + $0x8] sm:$0xff] %vm506_vm2, %v499_v59 }
  0xdd   :  { %v1131_v12 = vpop.f32.mrf.mxu3 }
  0xde   :  { %v434_v0 = vpop.f32.mrf.mxu0  ;;  %v1129_v10 = vpop.f32.mrf.mxu2 }
  0xdf   :  { %v451_v6 = vadd.f32 %v434_v0, %v382_v61  ;;  %v556_v61 = vadd.f32 %v1123_v56, %v1129_v10 }
  0xe0   :  { %v485_v45 = vpop.f32.mrf.mxu1 }
  0xe1   :  { %v500_v34 = vadd.f32 %v483_v60, %v451_v6 }
  0xe3   :  { %509 = vst.msk [vmem:[%s1251_s4 + $0x10] sm:$0xff] %vm506_vm2, %v500_v34 }
  0xe5   :  { %v1139_v5 = vpop.f32.mrf.mxu3 }
  0xe6   :  { %v436_v9 = vpop.f32.mrf.mxu0  ;;  %v1137_v21 = vpop.f32.mrf.mxu2 }
  0xe7   :  { %v452_v2 = vadd.f32 %v436_v9, %v383_v40  ;;  %v559_v62 = vadd.f32 %v1131_v12, %v1137_v21 }
  0xe8   :  { %v488_v17 = vpop.f32.mrf.mxu1 }
  0xe9   :  { %v501_v16 = vadd.f32 %v485_v45, %v452_v2 }
  0xeb   :  { %510 = vst.msk [vmem:[%s1251_s4 + $0x18] sm:$0xff] %vm506_vm2, %v501_v16 }
  0xed   :  { %v1150_v22 = vpop.f32.mrf.mxu3 }
  0xee   :  { %v439_v19 = vpop.f32.mrf.mxu0  ;;  %v1146_v23 = vpop.f32.mrf.mxu2 }
  0xef   :  { %v453_v24 = vadd.f32 %v439_v19, %v384_v18  ;;  %v561_v18 = vadd.f32 %v1139_v5, %v1146_v23 }
  0xf0   :  { %v490_v26 = vpop.f32.mrf.mxu1 }
  0xf1   :  { %v502_v25 = vadd.f32 %v488_v17, %v453_v24 }
  0xf3   :  { %511 = vst.msk [vmem:[%s1251_s4 + $0x20] sm:$0xff] %vm506_vm2, %v502_v25 }
  0xf5   :  { %v1161_v3 = vpop.f32.mrf.mxu3 }
  0xf6   :  { %v441_v57 = vpop.f32.mrf.mxu0  ;;  %v1157_v8 = vpop.f32.mrf.mxu2 }
  0xf7   :  { %v454_v32 = vadd.f32 %v441_v57, %v385_v30  ;;  %v564_v30 = vadd.f32 %v1150_v22, %v1157_v8 }
  0xf8   :  { %v493_v15 = vpop.f32.mrf.mxu1 }
  0xf9   :  { %v503_v37 = vadd.f32 %v490_v26, %v454_v32 }
  0xfb   :  { %512 = vst.msk [vmem:[%s1251_s4 + $0x28] sm:$0xff] %vm506_vm2, %v503_v37 }
  0xfd   :  { %v1173_v20 = vpop.f32.mrf.mxu3 }
  0xfe   :  { %v444_v1 = vpop.f32.mrf.mxu0  ;;  %v1169_v46 = vpop.f32.mrf.mxu2 }
  0xff   :  { %v455_v29 = vadd.f32 %v444_v1, %v386_v35 }
 0x100   :  { %v495_v49 = vpop.f32.mrf.mxu1 }
 0x101   :  { %v504_v48 = vadd.f32 %v493_v15, %v455_v29  ;;  %v566_v15 = vadd.f32 %v1161_v3, %v1169_v46 }
 0x103   :  { %513 = vst.msk [vmem:[%s1251_s4 + $0x30] sm:$0xff] %vm506_vm2, %v504_v48 }
 0x105   :  { %v1183_v54 = vpop.f32.mrf.mxu3 }
 0x106   :  { %v446_v50 = vpop.f32.mrf.mxu0  ;;  %v1181_v53 = vpop.f32.mrf.mxu2 }
 0x107   :  { %v456_v14 = vadd.f32 %v446_v50, %v387_v27 }
 0x108   :  { %v619_v36 = vpop.f32.mrf.mxu1 }
 0x109   :  { %v505_v41 = vadd.f32 %v495_v49, %v456_v14  ;;  %v569_v49 = vadd.f32 %v1173_v20, %v1181_v53 }
 0x10b   :  { %514 = vst.msk [vmem:[%s1251_s4 + $0x38] sm:$0xff] %vm506_vm2, %v505_v41 }
 0x10d   :  { %v693_v39 = vpop.f32.mrf.mxu3 }
 0x10e   :  { %v1189_v47 = vpop.f32.mrf.mxu2  ;;  %v582_v55 = vpop.f32.mrf.mxu0 }
 0x10f   :  { %v602_v63 = vadd.f32 %v582_v55, %v554_v4  ;;  %v571_v4 = vadd.f32 %v1183_v54, %v1189_v47 }
 0x110   :  { %v621_v7 = vpop.f32.mrf.mxu1 }
 0x111   :  { %v639_v52 = vadd.f32 %v619_v36, %v602_v63 }
 0x115   :  { %v695_v11 = vpop.f32.mrf.mxu3 }
 0x116   :  { %v584_v59 = vpop.f32.mrf.mxu0  ;;  %v656_v60 = vpop.f32.mrf.mxu2 }
 0x117   :  { %v676_v0 = vadd.f32 %v656_v60, %v639_v52  ;;  %v603_v6 = vadd.f32 %v584_v59, %v556_v61 }
 0x118   :  { %v624_v34 = vpop.f32.mrf.mxu1 }
 0x119   :  { %v713_v42 = vadd.f32 %v693_v39, %v676_v0  ;;  %v640_v45 = vadd.f32 %v621_v7, %v603_v6 }
 0x11b   :  { %729 = vrot.lane.b32.xlu0 %v713_v42, %s815_s9 }
 0x11d   :  { %v698_v13 = vpop.f32.mrf.mxu3 }
 0x11e   :  { %v587_v40 = vpop.f32.mrf.mxu0  ;;  %v658_v51 = vpop.f32.mrf.mxu2 }
 0x11f   :  { %v677_v9 = vadd.f32 %v658_v51, %v640_v45  ;;  %v604_v2 = vadd.f32 %v587_v40, %v559_v62 }
 0x120   :  { %v626_v56 = vpop.f32.mrf.mxu1 }
 0x121   :  { %v714_v58 = vadd.f32 %v695_v11, %v677_v9  ;;  %v641_v10 = vadd.f32 %v624_v34, %v604_v2 }
 0x123   :  { %731 = vrot.lane.b32.xlu0 %v714_v58, %s815_s9 }
 0x125   :  { %v700_v43 = vpop.f32.mrf.mxu3 }
 0x126   :  { %v589_v16 = vpop.f32.mrf.mxu0  ;;  %v661_v17 = vpop.f32.mrf.mxu2 }
 0x127   :  { %v678_v19 = vadd.f32 %v661_v17, %v641_v10  ;;  %v605_v24 = vadd.f32 %v589_v16, %v561_v18 }
 0x128   :  { %v629_v12 = vpop.f32.mrf.mxu1 }
 0x129   :  { %v715_v38 = vadd.f32 %v698_v13, %v678_v19  ;;  %v642_v21 = vadd.f32 %v626_v56, %v605_v24 }
 0x12b   :  { %733 = vrot.lane.b32.xlu1 %v715_v38, %s815_s9 }
 0x12d   :  { %v703_v33 = vpop.f32.mrf.mxu3 }
 0x12e   :  { %v592_v25 = vpop.f32.mrf.mxu0  ;;  %v663_v26 = vpop.f32.mrf.mxu2 }
 0x12f   :  { %v679_v57 = vadd.f32 %v663_v26, %v642_v21  ;;  %v606_v31 = vadd.f32 %v592_v25, %v564_v30 }
 0x130   :  { %v631_v1 = vpop.f32.mrf.mxu1 }
 0x131   :  { %v716_v32 = vadd.f32 %v700_v43, %v679_v57  ;;  %v643_v5 = vadd.f32 %v629_v12, %v606_v31 }
 0x133   :  { %735 = vrot.lane.b32.xlu1 %v716_v32, %s815_s9 }
 0x135   :  { %v705_v28 = vpop.f32.mrf.mxu3 }
 0x136   :  { %v594_v23 = vpop.f32.mrf.mxu0  ;;  %v666_v37 = vpop.f32.mrf.mxu2 }
 0x137   :  { %v680_v35 = vadd.f32 %v666_v37, %v643_v5  ;;  %v607_v44 = vadd.f32 %v594_v23, %v566_v15 }
 0x138   :  { %v634_v41 = vpop.f32.mrf.mxu1 }
 0x139   :  { %v717_v29 = vadd.f32 %v703_v33, %v680_v35  ;;  %v644_v22 = vadd.f32 %v631_v1, %v607_v44 }
 0x13b   :  { %737 = vrot.lane.b32.xlu2 %v717_v29, %s815_s9 }
 0x13d   :  { %v708_v3 = vpop.f32.mrf.mxu3 }
 0x13e   :  { %v597_v8 = vpop.f32.mrf.mxu0  ;;  %v668_v48 = vpop.f32.mrf.mxu2 }
 0x13f   :  { %v681_v27 = vadd.f32 %v668_v48, %v644_v22  ;;  %v608_v50 = vadd.f32 %v597_v8, %v569_v49 }
 0x140   :  { %v636_v52 = vpop.f32.mrf.mxu1 }
 0x141   :  { %v718_v14 = vadd.f32 %v705_v28, %v681_v27  ;;  %v645_v46 = vadd.f32 %v634_v41, %v608_v50 }
 0x143   :  { %739 = vrot.lane.b32.xlu2 %v718_v14, %s815_s9 }
 0x145   :  { %v710_v60 = vpop.f32.mrf.mxu3 }
 0x146   :  { %v599_v36 = vpop.f32.mrf.mxu0  ;;  %v671_v55 = vpop.f32.mrf.mxu2 }
 0x147   :  { %v682_v39 = vadd.f32 %v671_v55, %v645_v46  ;;  %v609_v63 = vadd.f32 %v599_v36, %v571_v4 }
 0x149   :  { %v719_v7 = vadd.f32 %v708_v3, %v682_v39  ;;  %v646_v20 = vadd.f32 %v636_v52, %v609_v63 }
 0x14b   :  { %741 = vrot.lane.b32.xlu0 %v719_v7, %s815_s9 }
 0x14e   :  { %v673_v53 = vpop.f32.mrf.mxu2 }
 0x14f   :  { %v683_v59 = vadd.f32 %v673_v53, %v646_v20 }
 0x151   :  { %v720_v61 = vadd.f32 %v710_v60, %v683_v59 }
 0x153   :  { %743 = vrot.lane.b32.xlu1 %v720_v61, %s815_s9 }
 0x18d   :  { %v730_v0 = vpop.permute.xlu0 %729 }
 0x18e   :  { %754 = vst.msk [vmem:[%s1251_s4] sm:$0xff] %vm753_vm3, %v730_v0 }
 0x195   :  { %v732_v54 = vpop.permute.xlu0 %731  ;;  %v738_v47 = vpop.permute.xlu2 %737 }
 0x196   :  { %755 = vst.msk [vmem:[%s1251_s4 + $0x8] sm:$0xff] %vm753_vm3, %v732_v54 }
 0x197   :  { %758 = vst.msk [vmem:[%s1251_s4 + $0x20] sm:$0xff] %vm753_vm3, %v738_v47 }
 0x19d   :  { %v734_v11 = vpop.permute.xlu1 %733  ;;  %v740_v6 = vpop.permute.xlu2 %739 }
 0x19e   :  { %756 = vst.msk [vmem:[%s1251_s4 + $0x10] sm:$0xff] %vm753_vm3, %v734_v11 }
 0x19f   :  { %759 = vst.msk [vmem:[%s1251_s4 + $0x28] sm:$0xff] %vm753_vm3, %v740_v6 }
 0x1a5   :  { %v736_v42 = vpop.permute.xlu1 %735 }
 0x1a6   :  { %757 = vst.msk [vmem:[%s1251_s4 + $0x18] sm:$0xff] %vm753_vm3, %v736_v42 }
 0x1bd   :  { %v742_v34 = vpop.permute.xlu0 %741 }
 0x1be   :  { %760 = vst.msk [vmem:[%s1251_s4 + $0x30] sm:$0xff] %vm753_vm3, %v742_v34 }
 0x1c5   :  { %v744_v45 = vpop.permute.xlu1 %743 }
 0x1c6   :  { %761 = vst.msk [vmem:[%s1251_s4 + $0x38] sm:$0xff] %vm753_vm3, %v744_v45 }

</bundles_post_ra>
